<compile_context>
chip_gen: v7x
topology: tpu7x:2x2x1
jax: 0.10.0
libtpu: 0.0.40
codegen_flags: <defaults>
</compile_context>

<pallas_src>
import functools

import jax
import jax.numpy as jnp
from jax.experimental import pallas as pl
from jax.experimental.pallas import tpu as pltpu

D = 128  # padded feature width (lane-dense); all layer dims must be < D


def _round_up(n, m):
    return ((n + m - 1) // m) * m


def qnet_kernel(x_ref, w_ref, o_ref):
    # x_ref: (TB, D) bf16, columns [0:input_dim] = x, column input_dim = 1.0.
    # w_ref: (3, D, D) bf16; biases folded in as an extra weight row, and the
    #        packed weights forward the ones column from layer to layer.
    x = x_ref[...]
    h = jnp.dot(x, w_ref[0], preferred_element_type=jnp.float32)   # l1 + b1
    h = jnp.maximum(h, 0.0).astype(jnp.bfloat16)                   # relu
    h = jnp.dot(h, w_ref[1], preferred_element_type=jnp.float32)   # l2 + b2
    h = jnp.maximum(h, 0.0).astype(jnp.bfloat16)                   # relu
    q = jnp.dot(h, w_ref[2], preferred_element_type=jnp.float32)   # l3 + b3
    o_ref[...] = q.astype(o_ref.dtype)


def init_qnet_params(key, input_dim, hidden_dims=(32, 32), num_actions=4):
    """nn.Linear-style init; weights stored [in, out] (== torch W.T)."""
    dims = (input_dim, hidden_dims[0], hidden_dims[1], num_actions)
    params = []
    for i in range(3):
        key, kw, kb = jax.random.split(key, 3)
        fan_in, fan_out = dims[i], dims[i + 1]
        bound = 1.0 / float(fan_in) ** 0.5
        w = jax.random.uniform(kw, (fan_in, fan_out), jnp.float32, -bound, bound)
        b = jax.random.uniform(kb, (fan_out,), jnp.float32, -bound, bound)
        params += [w, b]
    return params


def pack_params(params, input_dim, hidden_dims=(32, 32), num_actions=4):
    """Pack (w1,b1,w2,b2,w3,b3) into one bf16 (3, D, D) tensor.

    Per-layer block layout:
      [0:in_l , 0:out_l] = W_l  (stored [in, out])
      [in_l   , 0:out_l] = b_l  (picked up by the ones column of the input)
      [in_l   , out_l  ] = 1.0  (layers 0/1: forwards the ones column onward)
    """
    w1, b1, w2, b2, w3, b3 = params
    dims_in = (input_dim, hidden_dims[0], hidden_dims[1])
    dims_out = (hidden_dims[0], hidden_dims[1], num_actions)
    assert max(dims_in) < D and max(dims_out) < D, "layer dims must be < 128"
    blocks = []
    for l, (w, b) in enumerate(((w1, b1), (w2, b2), (w3, b3))):
        blk = jnp.zeros((D, D), jnp.float32)
        blk = blk.at[: dims_in[l], : dims_out[l]].set(w)
        blk = blk.at[dims_in[l], : dims_out[l]].set(b)
        if l < 2:
            blk = blk.at[dims_in[l], dims_out[l]].set(1.0)
        blocks.append(blk)
    return jnp.stack(blocks).astype(jnp.bfloat16)


@functools.partial(jax.jit, static_argnames=("num_actions",))
def qnet_forward(x, w_packed, num_actions=4):
    B, input_dim = x.shape
    TB = min(256, _round_up(B, 16))     # batch tile, sublane-aligned for bf16
    B_pad = _round_up(B, TB)

    # Augmented, lane-dense bf16 input: [x | 1 | 0 ...]; padded rows are junk
    # that gets sliced off after the call.
    x_aug = jnp.zeros((B_pad, D), jnp.float32)
    x_aug = x_aug.at[:B, :input_dim].set(x)
    x_aug = x_aug.at[:, input_dim].set(1.0)
    x_aug = x_aug.astype(jnp.bfloat16)

    out = pl.pallas_call(
        qnet_kernel,
        out_shape=jax.ShapeDtypeStruct((B_pad, D), jnp.float32),
        grid=(B_pad // TB,),
        in_specs=[
            pl.BlockSpec((TB, D), lambda i: (i, 0)),
            # Same block every step -> fetched once, stays VMEM-resident.
            pl.BlockSpec((3, D, D), lambda i: (0, 0, 0)),
        ],
        out_specs=pl.BlockSpec((TB, D), lambda i: (i, 0)),
        compiler_params=pltpu.CompilerParams(
            dimension_semantics=("parallel",)),
    )(x_aug, w_packed)
    # TODO(synk): for a high-frequency actor loop, keep w_packed resident
    # across calls (P10 cross-call prefetch) instead of re-DMAing every call.
    return out[:B, :num_actions]


def qnet_reference(x, params):
    """Pure-JAX reference mirroring the kernel numerics (bf16 in, f32 acc)."""
    q = lambda a: a.astype(jnp.bfloat16).astype(jnp.float32)
    w1, b1, w2, b2, w3, b3 = params
    t = jnp.maximum(q(x) @ q(w1) + q(b1), 0.0)
    t = jnp.maximum(q(t) @ q(w2) + q(b2), 0.0)
    return q(t) @ q(w3) + q(b3)


if __name__ == "__main__":
    key = jax.random.PRNGKey(0)
    k_x, k_p = jax.random.split(key)

    B, input_dim = 8, 16
    hidden_dims = (32, 32)
    num_actions = 4

    x = jax.random.normal(k_x, (B, input_dim), jnp.float32)
    params = init_qnet_params(k_p, input_dim, hidden_dims, num_actions)
    w_packed = pack_params(params, input_dim, hidden_dims, num_actions)

    out = qnet_forward(x, w_packed, num_actions=num_actions)
    out = jax.block_until_ready(out)

    ref = qnet_reference(x, params)
    assert out.shape == (B, num_actions)
    assert jnp.allclose(out, ref, atol=1e-4, rtol=1e-4), float(
        jnp.max(jnp.abs(out - ref)))

    print("KERNEL_OK")
</pallas_src>

<mosaic_0001>
module attributes {stable_mosaic.version = 11 : i64} {
  func.func @qnet_kernel(%arg0: i32, %arg1: memref<16x128xbf16, #tpu.memory_space<vmem>>, %arg2: memref<3x128x128xbf16, #tpu.memory_space<vmem>>, %arg3: memref<16x128xf32, #tpu.memory_space<vmem>>) attributes {dimension_semantics = [#tpu.dimension_semantics<parallel>], iteration_bounds = array<i64: 1>, scalar_prefetch = 0 : i64, scratch_operands = 0 : i64, tpu.core_type = #tpu.core_type<tc>, window_params = [{transform_indices = @transform_0, window_bounds = array<i64: 16, 128>}, {pipeline_mode = #tpu.pipeline_mode<synchronous>, transform_indices = @transform_1, window_bounds = array<i64: 3, 128, 128>}, {transform_indices = @transform_2, window_bounds = array<i64: 16, 128>}]} {
    %c0 = arith.constant 0 : index
    %c0_0 = arith.constant 0 : index
    %0 = vector.load %arg1[%c0, %c0_0] : memref<16x128xbf16, #tpu.memory_space<vmem>>, vector<16x128xbf16>
    %c0_1 = arith.constant 0 : index
    %c0_2 = arith.constant 0 : index
    %c0_3 = arith.constant 0 : index
    %1 = vector.load %arg2[%c0_1, %c0_2, %c0_3] : memref<3x128x128xbf16, #tpu.memory_space<vmem>>, vector<1x128x128xbf16>
    %2 = vector.shape_cast %1 : vector<1x128x128xbf16> to vector<128x128xbf16>
    %cst = arith.constant dense<0.000000e+00> : vector<16x128xf32>
    %3 = tpu.matmul %0, %2, %cst {dimension_numbers = #tpu.dot_dimension_numbers<[1], [0], [0], [1], [0, 0, 1, 1], [], []>} : vector<16x128xbf16>, vector<128x128xbf16>, vector<16x128xf32> -> vector<16x128xf32>
    %cst_4 = arith.constant 0.000000e+00 : f32
    %4 = vector.broadcast %cst_4 : f32 to vector<16x128xf32>
    %5 = arith.maximumf %3, %4 : vector<16x128xf32>
    %6 = arith.truncf %5 : vector<16x128xf32> to vector<16x128xbf16>
    %c1 = arith.constant 1 : index
    %c0_5 = arith.constant 0 : index
    %c0_6 = arith.constant 0 : index
    %7 = vector.load %arg2[%c1, %c0_5, %c0_6] : memref<3x128x128xbf16, #tpu.memory_space<vmem>>, vector<1x128x128xbf16>
    %8 = vector.shape_cast %7 : vector<1x128x128xbf16> to vector<128x128xbf16>
    %cst_7 = arith.constant dense<0.000000e+00> : vector<16x128xf32>
    %9 = tpu.matmul %6, %8, %cst_7 {dimension_numbers = #tpu.dot_dimension_numbers<[1], [0], [0], [1], [0, 0, 1, 1], [], []>} : vector<16x128xbf16>, vector<128x128xbf16>, vector<16x128xf32> -> vector<16x128xf32>
    %cst_8 = arith.constant 0.000000e+00 : f32
    %10 = vector.broadcast %cst_8 : f32 to vector<16x128xf32>
    %11 = arith.maximumf %9, %10 : vector<16x128xf32>
    %12 = arith.truncf %11 : vector<16x128xf32> to vector<16x128xbf16>
    %c2 = arith.constant 2 : index
    %c0_9 = arith.constant 0 : index
    %c0_10 = arith.constant 0 : index
    %13 = vector.load %arg2[%c2, %c0_9, %c0_10] : memref<3x128x128xbf16, #tpu.memory_space<vmem>>, vector<1x128x128xbf16>
    %14 = vector.shape_cast %13 : vector<1x128x128xbf16> to vector<128x128xbf16>
    %cst_11 = arith.constant dense<0.000000e+00> : vector<16x128xf32>
    %15 = tpu.matmul %12, %14, %cst_11 {dimension_numbers = #tpu.dot_dimension_numbers<[1], [0], [0], [1], [0, 0, 1, 1], [], []>} : vector<16x128xbf16>, vector<128x128xbf16>, vector<16x128xf32> -> vector<16x128xf32>
    %c0_12 = arith.constant 0 : index
    %c0_13 = arith.constant 0 : index
    %16 = vector.load %arg3[%c0_12, %c0_13] : memref<16x128xf32, #tpu.memory_space<vmem>>, vector<16x128xf32>
    tpu.vector_store %arg3[%c0_12, %c0_13], %15 {strides = array<i32>} : memref<16x128xf32, #tpu.memory_space<vmem>>, vector<16x128xf32>,
    return
  }
  func.func @transform_0(%arg0: i32) -> (i32, i32) {
    %c0_i32 = arith.constant 0 : i32
    %c0_i32_0 = arith.constant 0 : i32
    return %arg0, %c0_i32 : i32, i32
  }
  func.func @transform_1(%arg0: i32) -> (i32, i32, i32) {
    %c0_i32 = arith.constant 0 : i32
    %c0_i32_0 = arith.constant 0 : i32
    %c0_i32_1 = arith.constant 0 : i32
    %c0_i32_2 = arith.constant 0 : i32
    return %c0_i32, %c0_i32_0, %c0_i32_1 : i32, i32, i32
  }
  func.func @transform_2(%arg0: i32) -> (i32, i32) {
    %c0_i32 = arith.constant 0 : i32
    %c0_i32_0 = arith.constant 0 : i32
    return %arg0, %c0_i32 : i32, i32
  }
}

</mosaic_0001>

<bundles_post_ra>
// kernel: qnet_forward.1
= control target key start
LH: loop header
LB: loop body
LE: loop exit
PB: predicated region body
PF: predicated region fallthrough
CT: control target
= control target key end

     0   :  { %7 = vsyncpa [#allocation3], 0  ;;  %s530_s9 = smov [#allocation2]   ;;  %s601_s0 = inlined_call_operand.vmem [shape: bf16[16,128], index: 0, kind: input, shape index: {}]   ;;  %s602_s1 = inlined_call_operand.hbm [shape: bf16[3,128,128], index: 1, kind: input, shape index: {}]   ;;  %s603_s2 = inlined_call_operand.vmem [shape: f32[16,128], index: 2, kind: output, shape index: {}]  }
   0x1   :  { %s15_s10 = sshll.u32 %s530_s9, 4  ;;  %s506_s13 = scalar_lea.hbm %s602_s1, 3072  ;;  %s16_s10 = int_to_ptr.vmem [resolvable:$true] %s15_s10 }
   0x2   :  { %p507_p0 = scmp.ne.s32.totalorder %s602_s1, %s506_s13  ;;  %p510_p1 = scmp.lt.u32.totalorder %s506_s13, %s602_s1 }
   0x4   :  { %p512_p2 = pnand %p510_p1, %p507_p0 }
   0x6   :  { %515 = shalt.err (!%p512_p2)
}
   0x7   :  { %s516_s18 = scalar_lea.vmem %s16_s10, 3072  ;;  %p521_p4 = scmp.lt.s32.totalorder %s16_s10, %s16_s10 }
   0x8   :  { %p517_p3 = scmp.ne.s32.totalorder %s16_s10, %s516_s18  ;;  %p522_p5 = scmp.lt.s32.totalorder %s516_s18, %s516_s18 }
   0xa   :  { %p523_p6 = por %p522_p5, %p521_p4 }
   0xc   :  { %p524_p7 = pnand %p523_p6, %p517_p3 }
   0xe   :  { %527 = shalt.err (!%p524_p7)
}
   0xf   :  { %s531_s19 = smov 64   ;;  %s532_s20 = smov 4  }
  0x10   :  { %21 = dma.hbm_to_vmem [thread:$0]  %s602_s1, 3072, %s16_s10, [#allocation3], %s531_s19, %s531_s19, %s532_s20  }
  0x11   :  { %528 = dma.done.wait [#allocation3], 3072  }
  0x12   :  { %529 = vsyncadd [#allocation3], 4294964224  ;;  %v533_v0 = vmov 0.0   ;;  %vm534_vm0 = vmmov 0   ;;  %v481_v1 = vld [vmem:[#allocation2] sm:$0xff]   ;;  %v482_v2 = vld [vmem:[#allocation2 + $0x8] sm:$0xff]  }
  0x13   :  { %416 = vmatprep.subr.bf16.mxu0 %v533_v0  ;;  %432 = vmatprep.mubr.msk.bf16.mxu0 %vm534_vm0, %v533_v0  ;;  %v483_v3 = vld [vmem:[#allocation2 + $0x10] sm:$0xff]   ;;  %v490_v4 = vld [vmem:[#allocation2 + $0x40] sm:$0xff]   ;;  %v484_v5 = vld [vmem:[#allocation2 + $0x18] sm:$0xff]  }
  0x14   :  { %436 = vmatprep.subr.bf16.mxu1 %v533_v0  ;;  %452 = vmatprep.mubr.msk.bf16.mxu1 %vm534_vm0, %v533_v0  ;;  %v491_v6 = vld [vmem:[#allocation2 + $0x48] sm:$0xff]   ;;  %v485_v7 = vld [vmem:[#allocation2 + $0x20] sm:$0xff]   ;;  %v492_v8 = vld [vmem:[#allocation2 + $0x50] sm:$0xff]  }
  0x15   :  { %417 = vmatpush3.bf16.msra.mxu0 %v481_v1  ;;  %437 = vmatpush3.bf16.msra.mxu1 %v490_v4  ;;  %v486_v9 = vld [vmem:[#allocation2 + $0x28] sm:$0xff]   ;;  %v493_v10 = vld [vmem:[#allocation2 + $0x58] sm:$0xff]   ;;  %v487_v11 = vld [vmem:[#allocation2 + $0x30] sm:$0xff]  }
  0x16   :  { %418 = vmatprep.subr.bf16.mxu0 %v533_v0  ;;  %438 = vmatprep.subr.bf16.mxu1 %v533_v0  ;;  %v494_v12 = vld [vmem:[#allocation2 + $0x60] sm:$0xff]   ;;  %v488_v13 = vld [vmem:[#allocation2 + $0x38] sm:$0xff]   ;;  %v495_v14 = vld [vmem:[#allocation2 + $0x68] sm:$0xff]  }
  0x17   :  { %v489_v15 = vld [vmem:[%s601_s0] sm:$0xff]   ;;  %v496_v16 = vld [vmem:[#allocation2 + $0x70] sm:$0xff]   ;;  %v497_v17 = vld [vmem:[#allocation2 + $0x78] sm:$0xff]  }
  0x18   :  { %v498_v18 = vld [vmem:[#allocation2 + $0x80] sm:$0xff]   ;;  %v499_v19 = vld [vmem:[#allocation2 + $0x88] sm:$0xff]   ;;  %v500_v20 = vld [vmem:[#allocation2 + $0x90] sm:$0xff]  }
  0x19   :  { %419 = vmatpush3.bf16.msra.mxu0 %v482_v2  ;;  %439 = vmatpush3.bf16.msra.mxu1 %v491_v6  ;;  %v501_v21 = vld [vmem:[#allocation2 + $0x98] sm:$0xff]   ;;  %v502_v22 = vld [vmem:[#allocation2 + $0xa0] sm:$0xff]   ;;  %v503_v23 = vld [vmem:[#allocation2 + $0xa8] sm:$0xff]  }
  0x1a   :  { %420 = vmatprep.subr.bf16.mxu0 %v533_v0  ;;  %440 = vmatprep.subr.bf16.mxu1 %v533_v0  ;;  %v504_v31 = vld [vmem:[#allocation2 + $0xb0] sm:$0xff]   ;;  %v505_v32 = vld [vmem:[#allocation2 + $0xb8] sm:$0xff]  }
  0x1d   :  { %421 = vmatpush3.bf16.msra.mxu0 %v483_v3  ;;  %441 = vmatpush3.bf16.msra.mxu1 %v492_v8 }
  0x1e   :  { %422 = vmatprep.subr.bf16.mxu0 %v533_v0  ;;  %442 = vmatprep.subr.bf16.mxu1 %v533_v0 }
  0x21   :  { %423 = vmatpush3.bf16.msra.mxu0 %v484_v5  ;;  %443 = vmatpush3.bf16.msra.mxu1 %v493_v10 }
  0x22   :  { %424 = vmatprep.subr.bf16.mxu0 %v533_v0  ;;  %444 = vmatprep.subr.bf16.mxu1 %v533_v0 }
  0x25   :  { %425 = vmatpush3.bf16.msra.mxu0 %v485_v7  ;;  %445 = vmatpush3.bf16.msra.mxu1 %v494_v12 }
  0x26   :  { %426 = vmatprep.subr.bf16.mxu0 %v533_v0  ;;  %446 = vmatprep.subr.bf16.mxu1 %v533_v0 }
  0x29   :  { %427 = vmatpush3.bf16.msra.mxu0 %v486_v9  ;;  %447 = vmatpush3.bf16.msra.mxu1 %v495_v14 }
  0x2a   :  { %428 = vmatprep.subr.bf16.mxu0 %v533_v0  ;;  %448 = vmatprep.subr.bf16.mxu1 %v533_v0 }
  0x2d   :  { %429 = vmatpush3.bf16.msra.mxu0 %v487_v11  ;;  %449 = vmatpush3.bf16.msra.mxu1 %v496_v16 }
  0x2e   :  { %430 = vmatprep.subr.bf16.mxu0 %v533_v0  ;;  %450 = vmatprep.subr.bf16.mxu1 %v533_v0 }
  0x31   :  { %431 = vmatpush3.bf16.msra.mxu0 %v488_v13  ;;  %451 = vmatpush3.bf16.msra.mxu1 %v497_v17 }
  0x32   :  { %456 = vmatprep.subr.bf16.mxu0 %v533_v0 }
  0x34   :  { %433 = vmatmul.mubr.bf16.vlgmr.msra.gmra.mrb[0].mxu0 %v489_v15 }
  0x35   :  { %472 = vmatprep.mubr.msk.bf16.mxu0 %vm534_vm0, %v533_v0  ;;  %457 = vmatpush3.bf16.msra.mxu0 %v498_v18 }
  0x36   :  { %458 = vmatprep.subr.bf16.mxu0 %v533_v0 }
  0x39   :  { %459 = vmatpush3.bf16.msra.mxu0 %v499_v19 }
  0x3a   :  { %460 = vmatprep.subr.bf16.mxu0 %v533_v0 }
  0x3d   :  { %461 = vmatpush3.bf16.msra.mxu0 %v500_v20 }
  0x3e   :  { %462 = vmatprep.subr.bf16.mxu0 %v533_v0 }
  0x41   :  { %463 = vmatpush3.bf16.msra.mxu0 %v501_v21 }
  0x42   :  { %464 = vmatprep.subr.bf16.mxu0 %v533_v0 }
  0x45   :  { %465 = vmatpush3.bf16.msra.mxu0 %v502_v22 }
  0x46   :  { %466 = vmatprep.subr.bf16.mxu0 %v533_v0 }
  0x49   :  { %467 = vmatpush3.bf16.msra.mxu0 %v503_v23 }
  0x4a   :  { %468 = vmatprep.subr.bf16.mxu0 %v533_v0 }
  0x4d   :  { %469 = vmatpush3.bf16.msra.mxu0 %v504_v31 }
  0x4e   :  { %470 = vmatprep.subr.bf16.mxu0 %v533_v0 }
  0x51   :  { %471 = vmatpush3.bf16.msra.mxu0 %v505_v32 }
 0x107   :  { %v132_v24 = vpop.f32.mrb[0].mxu0 }
 0x108   :  { %v434_v25 = vpop.f32.mrb[1].mxu0  ;;  %v139_v27 = vmax.f32 %v132_v24, 0.0 }
 0x109   :  { %v135_v26 = vpop.f32.mrb[2].mxu0 }
 0x10a   :  { %v140_v28 = vmax.f32 %v135_v26, 0.0  ;;  %v435_v29 = vpop.f32.mrb[3].mxu0 }
 0x10c   :  { %v141_v30 = vpack.c.bf16 %v140_v28, %v139_v27 }
 0x10e   :  { %453 = vmatmul.mubr.bf16.vlgmr.msra.gmra.mrb[0].mxu1 %v141_v30 }
 0x1e1   :  { %v241_v33 = vpop.f32.mrb[0].mxu1 }
 0x1e2   :  { %v454_v34 = vpop.f32.mrb[1].mxu1  ;;  %v248_v36 = vmax.f32 %v241_v33, 0.0 }
 0x1e3   :  { %v244_v35 = vpop.f32.mrb[2].mxu1 }
 0x1e4   :  { %v249_v37 = vmax.f32 %v244_v35, 0.0  ;;  %v455_v38 = vpop.f32.mrb[3].mxu1 }
 0x1e6   :  { %v250_v39 = vpack.c.bf16 %v249_v37, %v248_v36 }
 0x1e8   :  { %473 = vmatmul.mubr.bf16.vlgmr.msra.gmra.mrb[4].mxu0 %v250_v39 }
 0x2bb   :  { %v350_v40 = vpop.f32.mrb[4].mxu0 }
 0x2bc   :  { %357 = vst [vmem:[%s603_s2] sm:$0xff] %v350_v40  ;;  %v474_v41 = vpop.f32.mrb[5].mxu0 }
 0x2bd   :  { %v353_v42 = vpop.f32.mrb[6].mxu0 }
 0x2be   :  { %358 = vst [vmem:[%s603_s2 + $0x8] sm:$0xff] %v353_v42  ;;  %v475_v43 = vpop.f32.mrb[7].mxu0 }
 0x2bf   :  { %363 = vsyncpa [#allocation3], 1 }

</bundles_post_ra>
